<compile_context>
chip_gen: v7x
topology: tpu7x:2x2x1
jax: 0.10.0
libtpu: 0.0.40
codegen_flags: <defaults>
</compile_context>

<pallas_src>
import functools

import numpy as np
import jax
import jax.numpy as jnp
from jax import lax
from jax.experimental import pallas as pl
from jax.experimental.pallas import tpu as pltpu


def _infonce_kernel(x_ref, w_ref, b_ref, loss_ref, *, inv_tau, n):
    """Per-batch-element Patch-InfoNCE partial loss (sum over its N rows).

    x_ref    : (1, C, 2N) bf16   [student | teacher] gathered features
    w_ref    : (C, C)     bf16   1x1-conv projection weight
    b_ref    : (C, 1)     f32    projection bias
    loss_ref : (1, 8, 128) f32   scalar partial loss, broadcast over the block
    """
    x = x_ref[0]                 # (C, 2N) bf16
    w = w_ref[...]               # (C, C)  bf16
    bias = b_ref[...]            # (C, 1)  f32

    # Fused student+teacher 1x1-conv projection: a single wide MXU matmul,
    # f32 accumulation, single (hoisted) bias broadcast.
    y = jnp.dot(w, x, preferred_element_type=jnp.float32) + bias     # (C, 2N) f32

    ys = y[:, :n]                # (C, N) student
    yt = y[:, n:]                # (C, N) teacher

    # F.normalize(..., dim=-1): L2 over the N sampled patches per channel row.
    # rsqrt(max(sumsq, eps^2)) == 1 / max(norm, eps) with eps = 1e-12 (torch).
    ys = ys * lax.rsqrt(jnp.maximum(jnp.sum(ys * ys, axis=-1, keepdims=True), 1e-24))
    yt = yt * lax.rsqrt(jnp.maximum(jnp.sum(yt * yt, axis=-1, keepdims=True), 1e-24))

    # sum_i l_pos[i] == sum_i sim[i, i] == sum over all (c, i) of ys * yt.
    diag_sum = jnp.sum(ys * yt)

    # Similarity logits (N, N): contraction over channels on the MXU (bf16).
    sim = lax.dot_general(
        ys.astype(jnp.bfloat16), yt.astype(jnp.bfloat16),
        (((0,), (0,)), ((), ())),
        preferred_element_type=jnp.float32) * inv_tau

    # Mask-free cross-entropy with target class 0:
    #   row_loss_i = logsumexp_j(sim[i, :]) - inv_tau * sim[i, i]
    m = jnp.max(sim, axis=-1, keepdims=True)                         # (N, 1)
    lse = m + jnp.log(jnp.sum(jnp.exp(sim - m), axis=-1, keepdims=True))
    part = jnp.sum(lse) - inv_tau * diag_sum

    # Lane-dense scalar write: fill the whole (1, 8, 128) block (unmasked vst).
    loss_ref[...] = jnp.broadcast_to(part.astype(jnp.float32), loss_ref.shape)


def layer_infonce_loss(fs_sel, ft_sel, w, b, tau):
    """One layer's InfoNCE loss via the Pallas kernel. fs_sel/ft_sel: (B, C, N)."""
    B, C, N = fs_sel.shape
    # [student | teacher] along the lane axis -> one wide projection matmul and
    # full 128-lane utilization even when N == 64.
    x_cat = jnp.concatenate([fs_sel, ft_sel], axis=-1).astype(jnp.bfloat16)  # (B,C,2N)
    w_bf = w.astype(jnp.bfloat16)
    b_col = b.reshape(C, 1).astype(jnp.float32)

    kernel = functools.partial(_infonce_kernel, inv_tau=float(1.0 / tau), n=N)
    cost = pl.CostEstimate(
        flops=B * (2 * C * C * 2 * N + 2 * C * N * N),
        transcendentals=B * (N * N + N + 2 * C),
        bytes_accessed=(x_cat.size * 2 + w_bf.size * 2 + b_col.size * 4
                        + B * 8 * 128 * 4),
    )
    out = pl.pallas_call(
        kernel,
        out_shape=jax.ShapeDtypeStruct((B, 8, 128), jnp.float32),
        grid=(B,),
        in_specs=[
            pl.BlockSpec((1, C, 2 * N), lambda bi: (bi, 0, 0)),
            pl.BlockSpec((C, C), lambda bi: (0, 0)),
            pl.BlockSpec((C, 1), lambda bi: (0, 0)),
        ],
        out_specs=pl.BlockSpec((1, 8, 128), lambda bi: (bi, 0, 0)),
        compiler_params=pltpu.CompilerParams(
            dimension_semantics=("parallel",)),
        cost_estimate=cost,
    )(x_cat, w_bf, b_col)
    # Per-b partial row-loss sums -> CrossEntropy mean over all B*N rows.
    return jnp.sum(out[:, 0, 0]) / (B * N)


def patch_infonce(ft, fs, proj_params, *, num_negs, tau, seed=0):
    """Mirror of Patch_infonce.forward.

    ft, fs      : dict layer -> (B, C, H, W)  (teacher / student features)
    proj_params : dict layer -> (W: (C, C), b: (C,))   1x1-conv projections
    """
    # Deterministic replacement for host-side np.random.choice in the original.
    rng = np.random.default_rng(seed)
    losses = []
    for layer in ft:
        x_s = fs[layer]
        x_t = ft[layer]
        B, C, H, W = x_s.shape
        length = H * W
        n = min(length, num_negs)
        idx = np.sort(rng.choice(length, size=n, replace=False))

        # Gather sampled patches (commutes with the 1x1-conv projection).
        fs_sel = x_s.reshape(B, C, length)[:, :, idx]
        ft_sel = x_t.reshape(B, C, length)[:, :, idx]

        w, b = proj_params[layer]
        losses.append(layer_infonce_loss(fs_sel, ft_sel, w, b, tau))
    return sum(losses) / len(losses)


# ----------------------- pure-JAX reference (for checking) -------------------
def _ref_layer_loss(fs_sel, ft_sel, w, b, tau):
    ys = jnp.einsum("oc,bcn->bon", w, fs_sel) + b[None, :, None]
    yt = jnp.einsum("oc,bcn->bon", w, ft_sel) + b[None, :, None]
    ys = ys / jnp.maximum(jnp.linalg.norm(ys, axis=-1, keepdims=True), 1e-12)
    yt = yt / jnp.maximum(jnp.linalg.norm(yt, axis=-1, keepdims=True), 1e-12)
    l_pos = jnp.sum(ys * yt, axis=1)[..., None]                  # (B, N, 1)
    l_neg = jnp.einsum("bci,bcj->bij", ys, yt)                   # (B, N, N)
    N = l_neg.shape[-1]
    eye = jnp.eye(N, dtype=bool)[None]
    l_neg = jnp.where(eye, -jnp.inf, l_neg)
    logits = jnp.concatenate([l_pos, l_neg], axis=-1) / tau
    logits = logits.reshape(-1, N + 1)
    lse = jax.scipy.special.logsumexp(logits, axis=-1)
    return jnp.mean(lse - logits[:, 0])


if __name__ == "__main__":
    key = jax.random.PRNGKey(0)
    num_negs = 128
    tau = 0.07

    # Two feature layers (teacher ft / student fs), NCHW.
    shapes = {
        "layer1": (2, 8, 16, 16),   # length = 256 -> N = 128
        "layer2": (2, 16, 8, 8),    # length = 64  -> N = 64
    }

    ft, fs, proj_params = {}, {}, {}
    for name, shp in shapes.items():
        key, k1, k2, k3, k4 = jax.random.split(key, 5)
        ft[name] = jax.random.normal(k1, shp, jnp.float32)
        fs[name] = jax.random.normal(k2, shp, jnp.float32)
        C = shp[1]
        # Deterministic 1x1-conv projection parameters (Conv2d(C, C, 1)).
        w = jax.random.normal(k3, (C, C), jnp.float32) / np.sqrt(C)
        b = jax.random.normal(k4, (C,), jnp.float32) * 0.01
        proj_params[name] = (w, b)

    loss = patch_infonce(ft, fs, proj_params, num_negs=num_negs, tau=tau, seed=0)
    loss = jax.block_until_ready(loss)

    # Sanity check against a pure-JAX f32 reference using the same indices
    # (kernel runs matmuls in bf16 with f32 accumulation -> loose tolerance).
    rng = np.random.default_rng(0)
    ref_losses = []
    for name in ft:
        B, C, H, W = ft[name].shape
        length = H * W
        n = min(length, num_negs)
        idx = np.sort(rng.choice(length, size=n, replace=False))
        fs_sel = fs[name].reshape(B, C, length)[:, :, idx]
        ft_sel = ft[name].reshape(B, C, length)[:, :, idx]
        w, b = proj_params[name]
        ref_losses.append(_ref_layer_loss(fs_sel, ft_sel, w, b, tau))
    ref = sum(ref_losses) / len(ref_losses)
    np.testing.assert_allclose(np.asarray(loss), np.asarray(ref), rtol=5e-2, atol=5e-2)

    print("KERNEL_OK")
</pallas_src>

<mosaic_0001>
module attributes {stable_mosaic.version = 11 : i64} {
  func.func @_infonce_kernel(%arg0: i32, %arg1: memref<1x8x256xbf16, #tpu.memory_space<vmem>>, %arg2: memref<8x8xbf16, #tpu.memory_space<vmem>>, %arg3: memref<8x1xf32, #tpu.memory_space<vmem>>, %arg4: memref<1x8x128xf32, #tpu.memory_space<vmem>>) attributes {dimension_semantics = [#tpu.dimension_semantics<parallel>], iteration_bounds = array<i64: 2>, scalar_prefetch = 0 : i64, scratch_operands = 0 : i64, tpu.core_type = #tpu.core_type<tc>, window_params = [{transform_indices = @transform_0, window_bounds = array<i64: 1, 8, 256>}, {pipeline_mode = #tpu.pipeline_mode<synchronous>, transform_indices = @transform_1, window_bounds = array<i64: 8, 8>}, {pipeline_mode = #tpu.pipeline_mode<synchronous>, transform_indices = @transform_2, window_bounds = array<i64: 8, 1>}, {transform_indices = @transform_3, window_bounds = array<i64: 1, 8, 128>}]} {
    %c0 = arith.constant 0 : index
    %c0_0 = arith.constant 0 : index
    %c0_1 = arith.constant 0 : index
    %0 = vector.load %arg1[%c0, %c0_0, %c0_1] : memref<1x8x256xbf16, #tpu.memory_space<vmem>>, vector<1x8x256xbf16>
    %1 = vector.shape_cast %0 : vector<1x8x256xbf16> to vector<8x256xbf16>
    %c0_2 = arith.constant 0 : index
    %c0_3 = arith.constant 0 : index
    %2 = vector.load %arg2[%c0_2, %c0_3] : memref<8x8xbf16, #tpu.memory_space<vmem>>, vector<8x8xbf16>
    %c0_4 = arith.constant 0 : index
    %c0_5 = arith.constant 0 : index
    %3 = vector.load %arg3[%c0_4, %c0_5] : memref<8x1xf32, #tpu.memory_space<vmem>>, vector<8x1xf32>
    %cst = arith.constant dense<0.000000e+00> : vector<8x256xf32>
    %4 = tpu.matmul %2, %1, %cst {dimension_numbers = #tpu.dot_dimension_numbers<[1], [0], [0], [1], [0, 0, 1, 1], [], []>} : vector<8x8xbf16>, vector<8x256xbf16>, vector<8x256xf32> -> vector<8x256xf32>
    %5 = vector.broadcast %3 : vector<8x1xf32> to vector<8x256xf32>
    %6 = arith.addf %4, %5 : vector<8x256xf32>
    %7 = vector.extract_strided_slice %6 {offsets = [0, 0], sizes = [8, 128], strides = [1, 1]} : vector<8x256xf32> to vector<8x128xf32>
    %8 = vector.extract_strided_slice %6 {offsets = [0, 128], sizes = [8, 128], strides = [1, 1]} : vector<8x256xf32> to vector<8x128xf32>
    %9 = arith.mulf %7, %7 : vector<8x128xf32>
    %cst_6 = arith.constant dense<0.000000e+00> : vector<8xf32>
    %10 = vector.multi_reduction <add>, %9, %cst_6 [1] : vector<8x128xf32> to vector<8xf32>
    %11 = vector.shape_cast %10 : vector<8xf32> to vector<8x1xf32>
    %cst_7 = arith.constant 1.000000e-24 : f32
    %12 = vector.broadcast %cst_7 : f32 to vector<8x1xf32>
    %13 = arith.maximumf %11, %12 : vector<8x1xf32>
    %14 = math.rsqrt %13 : vector<8x1xf32>
    %15 = vector.broadcast %14 : vector<8x1xf32> to vector<8x128xf32>
    %16 = arith.mulf %7, %15 : vector<8x128xf32>
    %17 = arith.mulf %8, %8 : vector<8x128xf32>
    %cst_8 = arith.constant dense<0.000000e+00> : vector<8xf32>
    %18 = vector.multi_reduction <add>, %17, %cst_8 [1] : vector<8x128xf32> to vector<8xf32>
    %19 = vector.shape_cast %18 : vector<8xf32> to vector<8x1xf32>
    %cst_9 = arith.constant 1.000000e-24 : f32
    %20 = vector.broadcast %cst_9 : f32 to vector<8x1xf32>
    %21 = arith.maximumf %19, %20 : vector<8x1xf32>
    %22 = math.rsqrt %21 : vector<8x1xf32>
    %23 = vector.broadcast %22 : vector<8x1xf32> to vector<8x128xf32>
    %24 = arith.mulf %8, %23 : vector<8x128xf32>
    %25 = arith.mulf %16, %24 : vector<8x128xf32>
    %26 = vector.shape_cast %25 : vector<8x128xf32> to vector<1x8x128xf32>
    %cst_10 = arith.constant dense<0.000000e+00> : vector<1xf32>
    %27 = vector.multi_reduction <add>, %26, %cst_10 [1, 2] : vector<1x8x128xf32> to vector<1xf32>
    %28 = vector.shape_cast %27 : vector<1xf32> to vector<1x1x1xf32>
    %29 = vector.extract %28[0, 0, 0] : f32 from vector<1x1x1xf32>
    %30 = arith.truncf %16 : vector<8x128xf32> to vector<8x128xbf16>
    %31 = arith.truncf %24 : vector<8x128xf32> to vector<8x128xbf16>
    %cst_11 = arith.constant dense<0.000000e+00> : vector<128x128xf32>
    %32 = tpu.matmul %30, %31, %cst_11 {dimension_numbers = #tpu.dot_dimension_numbers<[0], [0], [1], [1], [0, 1, 1, 1], [], []>} : vector<8x128xbf16>, vector<8x128xbf16>, vector<128x128xf32> -> vector<128x128xf32>
    %cst_12 = arith.constant 14.2857141 : f32
    %33 = vector.broadcast %cst_12 : f32 to vector<128x128xf32>
    %34 = arith.mulf %32, %33 : vector<128x128xf32>
    %cst_13 = arith.constant dense<0xFF800000> : vector<128xf32>
    %35 = vector.multi_reduction <maximumf>, %34, %cst_13 [1] : vector<128x128xf32> to vector<128xf32>
    %36 = vector.shape_cast %35 : vector<128xf32> to vector<128x1xf32>
    %37 = vector.broadcast %36 : vector<128x1xf32> to vector<128x128xf32>
    %38 = arith.subf %34, %37 : vector<128x128xf32>
    %39 = math.exp %38 : vector<128x128xf32>
    %cst_14 = arith.constant dense<0.000000e+00> : vector<128xf32>
    %40 = vector.multi_reduction <add>, %39, %cst_14 [1] : vector<128x128xf32> to vector<128xf32>
    %41 = vector.shape_cast %40 : vector<128xf32> to vector<128x1xf32>
    %42 = math.log %41 : vector<128x1xf32>
    %43 = arith.addf %36, %42 : vector<128x1xf32>
    %44 = vector.shape_cast %43 : vector<128x1xf32> to vector<1x128x1xf32>
    %cst_15 = arith.constant dense<0.000000e+00> : vector<1xf32>
    %45 = vector.multi_reduction <add>, %44, %cst_15 [1, 2] : vector<1x128x1xf32> to vector<1xf32>
    %46 = vector.shape_cast %45 : vector<1xf32> to vector<1x1x1xf32>
    %47 = vector.extract %46[0, 0, 0] : f32 from vector<1x1x1xf32>
    %cst_16 = arith.constant 14.2857141 : f32
    %48 = arith.mulf %cst_16, %29 : f32
    %49 = arith.subf %47, %48 : f32
    %50 = vector.broadcast %49 : f32 to vector<1x8x128xf32>
    %c0_17 = arith.constant 0 : index
    %c0_18 = arith.constant 0 : index
    %c0_19 = arith.constant 0 : index
    %51 = vector.load %arg4[%c0_17, %c0_18, %c0_19] : memref<1x8x128xf32, #tpu.memory_space<vmem>>, vector<1x8x128xf32>
    tpu.vector_store %arg4[%c0_17, %c0_18, %c0_19], %50 {strides = array<i32>} : memref<1x8x128xf32, #tpu.memory_space<vmem>>, vector<1x8x128xf32>,
    return
  }
  func.func @transform_0(%arg0: i32) -> (i32, i32, i32) {
    %c0_i32 = arith.constant 0 : i32
    %c0_i32_0 = arith.constant 0 : i32
    %c0_i32_1 = arith.constant 0 : i32
    return %arg0, %c0_i32, %c0_i32_0 : i32, i32, i32
  }
  func.func @transform_1(%arg0: i32) -> (i32, i32) {
    %c0_i32 = arith.constant 0 : i32
    %c0_i32_0 = arith.constant 0 : i32
    %c0_i32_1 = arith.constant 0 : i32
    return %c0_i32, %c0_i32_0 : i32, i32
  }
  func.func @transform_2(%arg0: i32) -> (i32, i32) {
    %c0_i32 = arith.constant 0 : i32
    %c0_i32_0 = arith.constant 0 : i32
    %c0_i32_1 = arith.constant 0 : i32
    return %c0_i32, %c0_i32_0 : i32, i32
  }
  func.func @transform_3(%arg0: i32) -> (i32, i32, i32) {
    %c0_i32 = arith.constant 0 : i32
    %c0_i32_0 = arith.constant 0 : i32
    %c0_i32_1 = arith.constant 0 : i32
    return %arg0, %c0_i32, %c0_i32_0 : i32, i32, i32
  }
}

</mosaic_0001>

<bundles_post_ra>
// kernel: tpu_custom_call.1
= control target key start
LH: loop header
LB: loop body
LE: loop exit
PB: predicated region body
PF: predicated region fallthrough
CT: control target
= control target key end

     0   :  { %8 = vsyncpa [#allocation3], 0  ;;  %s1318_s0 = inlined_call_operand.hbm [shape: bf16[2,8,256], index: 0, kind: input, shape index: {}]   ;;  %s1319_s1 = inlined_call_operand.vmem [shape: bf16[8,8], index: 1, kind: input, shape index: {}]   ;;  %s1320_s2 = inlined_call_operand.vmem [shape: f32[8,1], index: 2, kind: input, shape index: {}]   ;;  %s1321_s3 = inlined_call_operand.hbm [shape: f32[2,8,128], index: 3, kind: output, shape index: {}]  }
   0x1   :  { %10 = vsyncpa [#allocation3 + $0x1], 0 }
   0x2   :  { %11 = vsyncpa [#allocation4], 0 }
   0x3   :  { %13 = vsyncpa [#allocation4 + $0x1], 0  ;;  %s1022_s12 = smov 0   ;;  %s1024_s13 = smov 0  }
   0x4   :  { %s1026_s14 = smov 0   ;;  %s1028_s15 = smov 0  }
   0x5 LB: > { %s1043_s16 = sadd.s32 4294967295, %s997_s15   ;;  %s722_s17 = sadd.s32 4294967294, %s997_s15   ;;  %s997_s15 = sphi %s1028_s15, %s1336_s15   ;;  %s993_s14 = sphi %s1026_s14, %s1335_s14   ;;  %s989_s13 = sphi %s1024_s13, %s1334_s13   ;;  %s985_s12 = sphi %s1022_s12, %s1333_s12  }
   0x6   : > { %s1047_s18 = sadd.s32 1, %s997_s15   ;;  %s26_s19 = sadd.s32 1, %s993_s14 }
   0x7   : > { %s23_s20 = ssub.s32 %s997_s15, %s1047_s18  ;;  %p33_p0 = scmp.ne.s32.totalorder %s993_s14, %s989_s13 }
   0x8   : > { %p24_p1 = scmp.eq.s32.totalorder %s23_s20, 0  ;;  %p34_p2 = scmp.eq.s32.totalorder %s997_s15, 0 }
   0x9   : > { %p39_p3 = scmp.ne.s32.totalorder %s989_s13, %s985_s12  ;;  %p40_p4 = scmp.eq.s32.totalorder %s1043_s16, 0 }
   0xa   : > { %s1059_s21 = scalar_select %p24_p1, %s993_s14, %s26_s19  }
   0xb   : > { %p1061_p5 = por %p34_p2, %p33_p0  ;;  %p1065_p6 = por %p40_p4, %p39_p3 }
   0xc   : > { %p105_p7 = scmp.eq.s32.totalorder %s1043_s16, 1  ;;  %p111_p8 = scmp.eq.s32.totalorder %s722_s17, 1 }
   0xd   : > { %p795_p10 = scmp.lt.s32.totalorder %s997_s15, 2  ;;  %s137_s26 = sand.u32 1, %s993_s14  }
   0xe   : > { %p1072_p11 = por %p105_p7, %p33_p0  ;;  %p1076_p12 = por %p111_p8, %p39_p3 }
   0xf   : > { %s747_s27 = sshll.u32 %s997_s15, 7  ;;  %s725_s28 = sshll.u32 %s137_s26, 3 }
  0x10   : > { %s1325_s24 = scalar_select %p1072_p11, 1, 0 }
  0x11   : > { %s1326_s25 = scalar_select %p1076_p12, 1, 0 }
  0x12   : > { %s1085_s4 = scalar_lea.hbm %s1318_s0, %s747_s27  ;;  %s141_s5 = scalar_lea.vmem [#allocation2], %s725_s28 }
  0x13   : > { %s149_s6 = sshll.u32 %s141_s5, 4  ;;  %p1089_p13 = pnand %p795_p10, %p1061_p5  ;;  %s1093_s6 = int_to_ptr.vmem [resolvable:$true] %s149_s6 }
  0x14   : > { %s138_s8 = scalar_lea.sflag [#allocation3], %s137_s26  ;;  %s901_s9 = scalar_lea.hbm %s1085_s4, 128 }
  0x15   : > { %p902_p2 = scmp.ne.s32.totalorder %s1085_s4, %s901_s9  ;;  %p903_p3 = pneg %p1089_p13 }
  0x16   : > { %s906_s17 = scalar_lea.hbm %s1318_s0, 256  ;;  %p907_p5 = scmp.lt.u32.totalorder %s1085_s4, %s1318_s0 }
  0x17   : > { %p904_p4 = pnand %p903_p3, %p902_p2  ;;  %p908_p8 = scmp.lt.u32.totalorder %s906_s17, %s901_s9 }
  0x18   : > { %p910_p9 = scmp.lt.u32.totalorder %s901_s9, %s1085_s4 }
  0x19   : > { %p905_p7 = pneg %p904_p4  ;;  %p909_p10 = por %p908_p8, %p907_p5 }
  0x1b   : > { %p911_p0 = por %p910_p9, %p909_p10 }
  0x1d   : > { %p912_p1 = pnand %p911_p0, %p905_p7 }
  0x1f   : > { %915 = shalt.err (!%p912_p1)
}
  0x20   : > { %s916_s22 = scalar_lea.vmem %s1093_s6, 128  ;;  %s999_s26 = smov [#allocation2]  }
  0x21   : > { %p917_p2 = scmp.ne.s32.totalorder %s1093_s6, %s916_s22  ;;  %s921_s27 = sshll.u32 %s999_s26, 4  ;;  %s922_s27 = int_to_ptr.vmem [resolvable:$false] %s921_s27 }
  0x22   : > { %s923_s28 = scalar_lea.vmem %s922_s27, 256  ;;  %p924_p11 = scmp.lt.s32.totalorder %s1093_s6, %s922_s27 }
  0x23   : > { %p919_p4 = pnand %p917_p2, %p903_p3  ;;  %p925_p5 = scmp.lt.s32.totalorder %s923_s28, %s916_s22 }
  0x25   : > { %p920_p12 = pneg %p919_p4  ;;  %p926_p8 = por %p925_p5, %p924_p11 }
  0x27   : > { %p927_p9 = pnand %p926_p8, %p920_p12 }
  0x29   : > { %930 = shalt.err (!%p927_p9)
}
  0x2a   : > { %790 = dma.hbm_to_vmem [thread:$0]  (!%p1089_p13), %s1085_s4, 128, %s1093_s6, %s138_s8  }
  0x2b   : > { %p1328_p0 = scmp.lt.s32.totalorder %s997_s15, 3  ;;  %p1329_p1 = scmp.ge.s32.totalorder %s997_s15, 1 }
  0x2d   : > { %p155_p3 = pnand %p1329_p1, %p1328_p0 }
  0x2e   : > { %s1127_s29 = sand.u32 (!%p155_p3), 1, %s989_s13  }
  0x2f   : > { %158 = sbr.rel (%p155_p3) target bundleno = 1350 (0x546), region = 32  ;;  %s729_s30 = sshll.u32 (!%p155_p3), %s1127_s29, 3 }
  0x30   : > { %s161_s5 = scalar_lea.sflag (!%p155_p3), [#allocation3], %s1127_s29  ;;  %s164_s7 = scalar_lea.vmem (!%p155_p3), [#allocation2], %s729_s30 }
  0x36   : > { %976 = dma.done.wait (%p1065_p6), %s161_s5, 128  }
  0x37   : > { %978 = vsyncadd (%p1065_p6), %s161_s5, 4294967168  ;;  %v1000_v0 = vmov 0   ;;  %v188_v1 = vld [vmem:[%s164_s7] sm:$0xff]  ;;  %vm205_vm0 = vcmask 1043456   ;;  %vm201_vm1 = vcmask 64512   ;;  %vm593_vm2 = vcmask 7168  }
  0x38   : > { %244 = vmatprep.mubr.bf16.mxu0 %v1000_v0  ;;  %830 = vset.pattern.permute.xlu0 %v1000_v0  ;;  %v190_v2 = vld [vmem:[%s1320_s2] sm:$0xff]  ;;  %v732_v3 = vcombine.high %v188_v1, %v188_v1  ;;  %v731_v4 = vcombine.low %v188_v1, %v188_v1  ;;  %s744_s11 = sshll.u32 %s1043_s16, 7  ;;  %s186_s17 = scalar_lea.vmem [#allocation5], %s729_s30 }
  0x39   : > { %193 = vperm.xlu0 %830, %v190_v2   ;;  %v189_v6 = vld [vmem:[%s1319_s1] sm:$0xf]  ;;  %s652_s19 = sshll.u32 %s186_s17, 4  ;;  %s1274_s28 = scalar_lea.hbm %s1321_s3, %s744_s11  ;;  %s1276_s19 = int_to_ptr.vmem [resolvable:$true] %s652_s19 }
  0x3a   : > { %733 = vmatprep.subr.msk.bf16.mxu0 %vm205_vm0, %v732_v3  ;;  %v207_v5 = vsel %vm205_vm0, %v731_v4, 0  ;;  %s639_s5 = scalar_lea.sflag [#allocation4], %s1127_s29  ;;  %s931_s7 = scalar_lea.vmem %s1276_s19, 128 }
  0x3b   : > { %213 = vmatpush1.bf16.msra.mxu0 %v207_v5  ;;  %p932_p6 = scmp.ne.s32.totalorder %s1276_s19, %s931_s7  ;;  %p1330_p11 = scmp.ne.s32.totalorder %s1325_s24, 0 }
  0x3c   : > { %s1001_s16 = smov [#allocation5]  }
  0x3d   : > { %p933_p12 = pnand %p932_p6, %p1330_p11  ;;  %s935_s30 = sshll.u32 %s1001_s16, 4  ;;  %s936_s30 = int_to_ptr.vmem [resolvable:$false] %s935_s30 }
  0x3e   : > { %734 = vmatmul.mubr.msk.bf16.vlgmr.msra.gmra.mrb[0].mxu0 %vm201_vm1, %v189_v6  ;;  %s937_s4 = scalar_lea.vmem %s936_s30, 256  ;;  %p938_p7 = scmp.lt.s32.totalorder %s1276_s19, %s936_s30 }
  0x3f   : > { %p934_p13 = pneg %p933_p12  ;;  %p939_p10 = scmp.lt.s32.totalorder %s937_s4, %s931_s7 }
  0x41   : > { %p940_p2 = por %p939_p10, %p938_p7 }
  0x43   : > { %p941_p4 = pnand %p940_p2, %p934_p13 }
  0xb8   : > { %v194_v7 = vpop.permute.xlu0 %193 }
 0x111   : > { %v246_v8 = vpop.f32.mrb[0].mxu0 }
 0x112   : > { %v247_v9 = vadd.f32 %v246_v8, %v194_v7  ;;  %v248_v10 = vpop.f32.mrb[1].mxu0 }
 0x113   : > { %v249_v11 = vadd.f32 %v248_v10, %v194_v7  ;;  %v250_v12 = vpop.f32.mrb[2].mxu0 }
 0x114   : > { %v251_v13 = vpop.f32.mrb[3].mxu0  ;;  %v253_v14 = vmul.f32 %v247_v9, %v247_v9 }
 0x115   : > { %v259_v15 = vmul.f32 %v249_v11, %v249_v11 }
 0x116   : > { %254 = vadd.xlane.f32.xlu0 %v253_v14 }
 0x117   : > { %260 = vadd.xlane.f32.xlu1 %v259_v15 }
 0x1a3   : > { %v255_v16 = vpop.xlane.xlu0 %254 }
 0x1a4   : > { %v256_v17 = vmax.f32 %v255_v16, 1e-24  ;;  %v261_v18 = vpop.xlane.xlu1 %260 }
 0x1a5   : > { %v262_v19 = vmax.f32 %v261_v18, 1e-24 }
 0x1a6   : > { %833 = vrsqrt.f32 %v256_v17 }
 0x1a7   : > { %835 = vrsqrt.f32 %v262_v19 }
 0x1b0   : > { %v834_v20 = vpop.eup %833 }
 0x1b1   : > { %v836_v21 = vpop.eup %835  ;;  %v258_v22 = vmul.f32 %v834_v20, %v247_v9 }
 0x1b2   : > { %v264_v23 = vmul.f32 %v836_v21, %v249_v11 }
 0x1b3   : > { %v275_v24 = vpack.c.bf16 %v258_v22, %v258_v22 }
 0x1b4   : > { %v276_v25 = vpack.c.bf16 %v264_v23, %v264_v23  ;;  %v1146_v26 = vmul.f32 %v264_v23, %v258_v22 }
 0x1b5   : > { %277 = vxpose.xlu1.c.b16.start.end [1/1] (short) %v275_v24, 128 }
 0x1b6   : > { %777 = vmatprep.subr.msk.bf16.mxu0 %vm205_vm0, %v276_v25  ;;  %778 = vmatprep.subr.msk.bf16.mxu1 %vm205_vm0, %v276_v25  ;;  %v318_v27 = vsel %vm205_vm0, %v276_v25, 0 }
 0x1b7   : > { %758 = vmatpush3.bf16.msra.mxu0 %v318_v27  ;;  %776 = vmatpush3.bf16.msra.mxu1 %v318_v27 }
 0x21b   : > { %v285_v28 = vpop.trf.xlu1 }
 0x21c   : > { %759 = vmatprep.mubr.msk.bf16.mxu0 %vm201_vm1, %v285_v28 }
 0x21f   : > { %v286_v29 = vpop.trf.xlu1 }
 0x220   : > { %760 = vmatmul.mubr.msk.bf16.vlgmr.msra.gmra.mrb[4].mxu0 %vm201_vm1, %v286_v29 }
 0x223   : > { %v287_v30 = vpop.trf.xlu1 }
 0x224   : > { %763 = vmatprep.mubr.msk.bf16.mxu1 %vm201_vm1, %v287_v30 }
 0x227   : > { %v288_v31 = vpop.trf.xlu1 }
 0x228   : > { %764 = vmatmul.mubr.msk.bf16.vlgmr.msra.gmra.mrb[0].mxu1 %vm201_vm1, %v288_v31 }
 0x22b   : > { %v289_v32 = vpop.trf.xlu1 }
 0x22c   : > { %767 = vmatprep.mubr.msk.bf16.mxu1 %vm201_vm1, %v289_v32 }
 0x22f   : > { %v290_v33 = vpop.trf.xlu1 }
 0x230   : > { %768 = vmatmul.mubr.msk.bf16.gmra.mrb[4].mxu1 %vm201_vm1, %v290_v33 }
 0x233   : > { %v291_v34 = vpop.trf.xlu1 }
 0x234   : > { %771 = vmatprep.mubr.msk.bf16.mxu1 %vm201_vm1, %v291_v34 }
 0x237   : > { %v292_v35 = vpop.trf.xlu1 }
 0x238   : > { %772 = vmatmul.mubr.msk.bf16.gmra.mrb[8].mxu1 %vm201_vm1, %v292_v35 }
 0x2f3   : > { %v761_v36 = vpop.f32.mrb[4].mxu0 }
 0x2f4   : > { %v419_v37 = vmul.f32 14.285714, %v761_v36  ;;  %v354_v38 = vpop.f32.mrb[5].mxu0 }
 0x2f5   : > { %v762_v39 = vpop.f32.mrb[6].mxu0  ;;  %v417_v41 = vmul.f32 14.285714, %v354_v38 }
 0x2f6   : > { %437 = vmax.xlane.f32.xlu0 %v419_v37  ;;  %v357_v40 = vpop.f32.mrb[7].mxu0  ;;  %v420_v43 = vmul.f32 14.285714, %v762_v39 }
 0x2f7   : > { %v418_v48 = vmul.f32 14.285714, %v357_v40 }
 0x2fa   : > { %433 = vmax.xlane.f32.xlu0 %v417_v41 }
 0x2fb   : > { %v765_v42 = vpop.f32.mrb[0].mxu1 }
 0x2fc   : > { %v370_v44 = vpop.f32.mrb[1].mxu1  ;;  %v423_v49 = vmul.f32 14.285714, %v765_v42 }
 0x2fd   : > { %v421_v45 = vmul.f32 14.285714, %v370_v44  ;;  %v766_v46 = vpop.f32.mrb[2].mxu1 }
 0x2fe   : > { %439 = vmax.xlane.f32.xlu0 %v420_v43  ;;  %v373_v47 = vpop.f32.mrb[3].mxu1  ;;  %v424_v54 = vmul.f32 14.285714, %v766_v46 }
 0x2ff   : > { %441 = vmax.xlane.f32.xlu1 %v421_v45  ;;  %v422_v56 = vmul.f32 14.285714, %v373_v47 }
 0x302   : > { %435 = vmax.xlane.f32.xlu0 %v418_v48 }
 0x303   : > { %v769_v50 = vpop.f32.mrb[4].mxu1 }
 0x304   : > { %v386_v51 = vpop.f32.mrb[5].mxu1  ;;  %v1159_v59 = vmul.f32 14.285714, %v769_v50 }
 0x305   : > { %v770_v52 = vpop.f32.mrb[6].mxu1  ;;  %v425_v62 = vmul.f32 14.285714, %v386_v51 }
 0x306   : > { %445 = vmax.xlane.f32.xlu0 %v423_v49  ;;  %v389_v53 = vpop.f32.mrb[7].mxu1  ;;  %v1165_v63 = vmul.f32 14.285714, %v770_v52 }
 0x307   : > { %v1168_v0 = vmul.f32 14.285714, %v389_v53 }
 0x30a   : > { %447 = vmax.xlane.f32.xlu0 %v424_v54 }
 0x30b   : > { %v773_v55 = vpop.f32.mrb[8].mxu1 }
 0x30c   : > { %v402_v57 = vpop.f32.mrb[9].mxu1  ;;  %v1177_v3 = vmul.f32 14.285714, %v773_v55 }
 0x30d   : > { %v774_v58 = vpop.f32.mrb[10].mxu1  ;;  %v1170_v1 = vmul.f32 14.285714, %v402_v57 }
 0x30e   : > { %v1161_v60 = vmul.f32 14.285714, %v774_v58  ;;  %443 = vmax.xlane.f32.xlu0 %v422_v56  ;;  %v405_v61 = vpop.f32.mrb[11].mxu1 }
 0x30f   : > { %v1174_v2 = vmul.f32 14.285714, %v405_v61 }
 0x310   : > { %463 = vmax.xlane.f32.xlu1 %v1161_v60 }
 0x312   : > { %453 = vmax.xlane.f32.xlu0 %v1159_v59 }
 0x316   : > { %449 = vmax.xlane.f32.xlu0 %v425_v62 }
 0x31a   : > { %455 = vmax.xlane.f32.xlu0 %v1165_v63 }
 0x31e   : > { %451 = vmax.xlane.f32.xlu0 %v1168_v0 }
 0x322   : > { %457 = vmax.xlane.f32.xlu0 %v1170_v1 }
 0x326   : > { %459 = vmax.xlane.f32.xlu0 %v1174_v2 }
 0x32a   : > { %461 = vmax.xlane.f32.xlu0 %v1177_v3 }
 0x383   : > { %v1180_v4 = vpop.xlane.xlu0 %437 }
 0x384   : > { %v467_v6 = vsub.f32 %v419_v37, %v1180_v4 }
 0x386   : > { %v485_v10 = vmul.f32 1.442695, %v467_v6 }
 0x387   : > { %v1182_v5 = vpop.xlane.xlu0 %433 }
 0x388   : > { %v465_v7 = vsub.f32 %v417_v41, %v1182_v5 }
 0x38a   : > { %v481_v8 = vmul.f32 1.442695, %v465_v7 }
 0x38b   : > { %v1186_v9 = vpop.xlane.xlu0 %439 }
 0x38c   : > { %837 = vpow2.f32 %v481_v8  ;;  %v1188_v11 = vpop.xlane.xlu1 %441  ;;  %v468_v13 = vsub.f32 %v420_v43, %v1186_v9 }
 0x38d   : > { %v469_v12 = vsub.f32 %v421_v45, %v1188_v11  ;;  %839 = vpow2.f32 %v485_v10 }
 0x38e   : > { %v487_v18 = vmul.f32 1.442695, %v468_v13 }
 0x38f   : > { %v489_v14 = vmul.f32 1.442695, %v469_v12  ;;  %v1192_v15 = vpop.xlane.xlu0 %435 }
 0x390   : > { %v466_v16 = vsub.f32 %v418_v48, %v1192_v15 }
 0x391   : > { %841 = vpow2.f32 %v489_v14 }
 0x392   : > { %v483_v17 = vmul.f32 1.442695, %v466_v16 }
 0x393   : > { %v1195_v19 = vpop.xlane.xlu0 %445 }
 0x394   : > { %843 = vpow2.f32 %v483_v17  ;;  %v471_v20 = vsub.f32 %v423_v49, %v1195_v19 }
 0x395   : > { %845 = vpow2.f32 %v487_v18 }
 0x396   : > { %v838_v21 = vpop.eup %837  ;;  %v493_v22 = vmul.f32 1.442695, %v471_v20 }
 0x397   : > { %v1198_v23 = vpop.xlane.xlu0 %447  ;;  %513 = vadd.xlane.f32.xlu0 %v838_v21  ;;  %v840_v24 = vpop.eup %839 }
 0x398   : > { %847 = vpow2.f32 %v493_v22  ;;  %v472_v27 = vsub.f32 %v424_v54, %v1198_v23 }
 0x39a   : > { %v495_v33 = vmul.f32 1.442695, %v472_v27 }
 0x39b   : > { %v1200_v25 = vpop.xlane.xlu0 %443  ;;  %517 = vadd.xlane.f32.xlu0 %v840_v24  ;;  %v842_v29 = vpop.eup %841 }
 0x39c   : > { %v470_v28 = vsub.f32 %v422_v56, %v1200_v25 }
 0x39d   : > { %v1221_v50 = vpop.xlane.xlu1 %463 }
 0x39e   : > { %v844_v30 = vpop.eup %843  ;;  %v491_v31 = vmul.f32 1.442695, %v470_v28  ;;  %v480_v54 = vsub.f32 %v1161_v60, %v1221_v50 }
 0x39f   : > { %v1204_v32 = vpop.xlane.xlu0 %453  ;;  %515 = vadd.xlane.f32.xlu1 %v844_v30  ;;  %521 = vadd.xlane.f32.xlu0 %v842_v29  ;;  %v846_v34 = vpop.eup %845 }
 0x3a0   : > { %849 = vpow2.f32 %v491_v31  ;;  %v475_v37 = vsub.f32 %v1159_v59, %v1204_v32  ;;  %v511_v59 = vmul.f32 1.442695, %v480_v54 }
 0x3a1   : > { %851 = vpow2.f32 %v495_v33 }
 0x3a2   : > { %v848_v35 = vpop.eup %847  ;;  %v501_v41 = vmul.f32 1.442695, %v475_v37 }
 0x3a3   : > { %v1206_v36 = vpop.xlane.xlu0 %449  ;;  %519 = vadd.xlane.f32.xlu1 %v846_v34  ;;  %525 = vadd.xlane.f32.xlu0 %v848_v35 }
 0x3a4   : > { %v473_v38 = vsub.f32 %v425_v62, %v1206_v36 }
 0x3a6   : > { %v497_v39 = vmul.f32 1.442695, %v473_v38 }
 0x3a7   : > { %v1211_v40 = vpop.xlane.xlu0 %455 }
 0x3a8   : > { %853 = vpow2.f32 %v497_v39  ;;  %v476_v43 = vsub.f32 %v1165_v63, %v1211_v40 }
 0x3a9   : > { %855 = vpow2.f32 %v501_v41 }
 0x3aa   : > { %v850_v42 = vpop.eup %849  ;;  %v503_v48 = vmul.f32 1.442695, %v476_v43 }
 0x3ab   : > { %v1215_v44 = vpop.xlane.xlu0 %451  ;;  %523 = vadd.xlane.f32.xlu1 %v850_v42  ;;  %v852_v46 = vpop.eup %851 }
 0x3ac   : > { %v474_v45 = vsub.f32 %v1168_v0, %v1215_v44 }
 0x3ae   : > { %v499_v47 = vmul.f32 1.442695, %v474_v45 }
 0x3af   : > { %v1219_v49 = vpop.xlane.xlu0 %457  ;;  %527 = vadd.xlane.f32.xlu1 %v852_v46 }
 0x3b0   : > { %857 = vpow2.f32 %v499_v47  ;;  %v477_v51 = vsub.f32 %v1170_v1, %v1219_v49 }
 0x3b1   : > { %859 = vpow2.f32 %v503_v48 }
 0x3b2   : > { %v854_v52 = vpop.eup %853  ;;  %v505_v53 = vmul.f32 1.442695, %v477_v51 }
 0x3b3   : > { %v1227_v55 = vpop.xlane.xlu0 %459  ;;  %529 = vadd.xlane.f32.xlu0 %v854_v52  ;;  %v856_v57 = vpop.eup %855 }
 0x3b4   : > { %861 = vpow2.f32 %v505_v53  ;;  %v478_v56 = vsub.f32 %v1174_v2, %v1227_v55 }
 0x3b6   : > { %v507_v58 = vmul.f32 1.442695, %v478_v56 }
 0x3b7   : > { %v1231_v61 = vpop.xlane.xlu0 %461  ;;  %533 = vadd.xlane.f32.xlu0 %v856_v57 }
 0x3b8   : > { %863 = vpow2.f32 %v507_v58  ;;  %v479_v62 = vsub.f32 %v1177_v3, %v1231_v61 }
 0x3b9   : > { %865 = vpow2.f32 %v511_v59 }
 0x3ba   : > { %v858_v63 = vpop.eup %857  ;;  %v509_v60 = vmul.f32 1.442695, %v479_v62 }
 0x3bb   : > { %531 = vadd.xlane.f32.xlu1 %v858_v63  ;;  %v860_v0 = vpop.eup %859 }
 0x3bc   : > { %867 = vpow2.f32 %v509_v60 }
 0x3be   : > { %v862_v1 = vpop.eup %861 }
 0x3bf   : > { %535 = vadd.xlane.f32.xlu1 %v860_v0  ;;  %537 = vadd.xlane.f32.xlu0 %v862_v1 }
 0x3c2   : > { %v864_v2 = vpop.eup %863 }
 0x3c3   : > { %539 = vadd.xlane.f32.xlu1 %v864_v2  ;;  %v866_v6 = vpop.eup %865 }
 0x3c6   : > { %v868_v7 = vpop.eup %867 }
 0x3c7   : > { %541 = vadd.xlane.f32.xlu0 %v868_v7  ;;  %543 = vadd.xlane.f32.xlu1 %v866_v6 }
 0x3cb   : > { %266 = vadd.xlane.f32.xlu0 %v1146_v26 }
 0x424   : > { %v514_v8 = vpop.xlane.xlu0 %513 }
 0x425   : > { %869 = vlog2.f32 %v514_v8 }
 0x428   : > { %v518_v3 = vpop.xlane.xlu0 %517 }
 0x429   : > { %871 = vlog2.f32 %v518_v3 }
 0x42c   : > { %v516_v10 = vpop.xlane.xlu1 %515  ;;  %v522_v13 = vpop.xlane.xlu0 %521 }
 0x42d   : > { %873 = vlog2.f32 %v516_v10 }
 0x42f   : > { %v870_v14 = vpop.eup %869 }
 0x430   : > { %v520_v12 = vpop.xlane.xlu1 %519  ;;  %v546_v16 = vmul.f32 0.6931472, %v870_v14  ;;  %v526_v20 = vpop.xlane.xlu0 %525 }
 0x431   : > { %875 = vlog2.f32 %v520_v12 }
 0x432   : > { %877 = vlog2.f32 %v522_v13  ;;  %v577_v26 = vadd.f32 %v546_v16, %v1182_v5 }
 0x433   : > { %v872_v17 = vpop.eup %871 }
 0x434   : > { %v550_v24 = vmul.f32 0.6931472, %v872_v17  ;;  %v594_v33 = vsel %vm593_vm2, %v577_v26, 0.0 }
 0x436   : > { %v579_v34 = vadd.f32 %v550_v24, %v1180_v4 }
 0x437   : > { %v874_v18 = vpop.eup %873 }
 0x438   : > { %v524_v21 = vpop.xlane.xlu1 %523  ;;  %v548_v22 = vmul.f32 0.6931472, %v874_v18  ;;  %v597_v39 = vsel %vm593_vm2, %v579_v34, 0.0 }
 0x439   : > { %879 = vlog2.f32 %v524_v21 }
 0x43a   : > { %v578_v27 = vadd.f32 %v548_v22, %v1192_v15  ;;  %881 = vlog2.f32 %v526_v20 }
 0x43b   : > { %v876_v28 = vpop.eup %875 }
 0x43c   : > { %v528_v29 = vpop.xlane.xlu1 %527  ;;  %v595_v30 = vsel %vm593_vm2, %v578_v27, 0.0  ;;  %v552_v31 = vmul.f32 0.6931472, %v876_v28  ;;  %v878_v35 = vpop.eup %877 }
 0x43d   : > { %883 = vlog2.f32 %v528_v29  ;;  %v596_v37 = vadd.f32 %v595_v30, %v594_v33  ;;  %v554_v15 = vmul.f32 0.6931472, %v878_v35 }
 0x43e   : > { %v580_v38 = vadd.f32 %v552_v31, %v1186_v9 }
 0x43f   : > { %v598_v42 = vadd.f32 %v597_v39, %v596_v37  ;;  %v581_v48 = vadd.f32 %v554_v15, %v1188_v11 }
 0x440   : > { %v530_v5 = vpop.xlane.xlu0 %529  ;;  %v599_v43 = vsel %vm593_vm2, %v580_v38, 0.0 }
 0x441   : > { %885 = vlog2.f32 %v530_v5  ;;  %v600_v52 = vadd.f32 %v599_v43, %v598_v42  ;;  %v601_v54 = vsel %vm593_vm2, %v581_v48, 0.0 }
 0x443   : > { %v880_v41 = vpop.eup %879  ;;  %v602_v59 = vadd.f32 %v601_v54, %v600_v52 }
 0x444   : > { %v556_v45 = vmul.f32 0.6931472, %v880_v41  ;;  %v534_v46 = vpop.xlane.xlu0 %533  ;;  %v882_v47 = vpop.eup %881 }
 0x445   : > { %887 = vlog2.f32 %v534_v46  ;;  %v558_v9 = vmul.f32 0.6931472, %v882_v47 }
 0x446   : > { %v582_v4 = vadd.f32 %v556_v45, %v1200_v25 }
 0x447   : > { %v884_v51 = vpop.eup %883  ;;  %v583_v62 = vadd.f32 %v558_v9, %v1195_v19 }
 0x448   : > { %v532_v53 = vpop.xlane.xlu1 %531  ;;  %v603_v56 = vsel %vm593_vm2, %v582_v4, 0.0  ;;  %v560_v57 = vmul.f32 0.6931472, %v884_v51 }
 0x449   : > { %889 = vlog2.f32 %v532_v53  ;;  %v604_v11 = vadd.f32 %v603_v56, %v602_v59  ;;  %v605_v2 = vsel %vm593_vm2, %v583_v62, 0.0 }
 0x44a   : > { %v584_v25 = vadd.f32 %v560_v57, %v1198_v23 }
 0x44b   : > { %v886_v58 = vpop.eup %885  ;;  %v606_v8 = vadd.f32 %v605_v2, %v604_v11 }
 0x44c   : > { %v562_v63 = vmul.f32 0.6931472, %v886_v58  ;;  %v538_v60 = vpop.xlane.xlu0 %537  ;;  %v536_v0 = vpop.xlane.xlu1 %535  ;;  %v607_v3 = vsel %vm593_vm2, %v584_v25, 0.0 }
 0x44d   : > { %891 = vlog2.f32 %v538_v60  ;;  %v608_v17 = vadd.f32 %v607_v3, %v606_v8 }
 0x44e   : > { %893 = vlog2.f32 %v536_v0  ;;  %v585_v6 = vadd.f32 %v562_v63, %v1206_v36 }
 0x44f   : > { %v888_v1 = vpop.eup %887 }
 0x450   : > { %v540_v7 = vpop.xlane.xlu1 %539  ;;  %v566_v10 = vmul.f32 0.6931472, %v888_v1  ;;  %v609_v12 = vsel %vm593_vm2, %v585_v6, 0.0 }
 0x451   : > { %895 = vlog2.f32 %v540_v7  ;;  %v610_v20 = vadd.f32 %v609_v12, %v608_v17 }
 0x452   : > { %v587_v23 = vadd.f32 %v566_v10, %v1204_v32 }
 0x453   : > { %v890_v19 = vpop.eup %889 }
 0x454   : > { %v564_v13 = vmul.f32 0.6931472, %v890_v19  ;;  %v542_v14 = vpop.xlane.xlu0 %541  ;;  %v544_v16 = vpop.xlane.xlu1 %543  ;;  %v613_v30 = vsel %vm593_vm2, %v587_v23, 0.0 }
 0x455   : > { %897 = vlog2.f32 %v542_v14 }
 0x456   : > { %v586_v18 = vadd.f32 %v564_v13, %v1215_v44  ;;  %899 = vlog2.f32 %v544_v16 }
 0x457   : > { %v892_v36 = vpop.eup %891 }
 0x458   : > { %v894_v21 = vpop.eup %893  ;;  %v611_v22 = vsel %vm593_vm2, %v586_v18, 0.0  ;;  %v570_v26 = vmul.f32 0.6931472, %v892_v36  ;;  %v267_v24 = vpop.xlane.xlu0 %266 }
 0x459   : > { %v612_v27 = vadd.f32 %v611_v22, %v610_v20  ;;  %v568_v28 = vmul.f32 0.6931472, %v894_v21  ;;  %v268_v29 = vrot.slane %v267_v24, 4 }
 0x45a   : > { %v589_v33 = vadd.f32 %v570_v26, %v1219_v49 }
 0x45b   : > { %v896_v31 = vpop.eup %895  ;;  %v614_v34 = vadd.f32 %v613_v30, %v612_v27  ;;  %v588_v32 = vadd.f32 %v568_v28, %v1211_v40  ;;  %v269_v44 = vadd.f32 %v268_v29, %v267_v24 }
 0x45c   : > { %v572_v35 = vmul.f32 0.6931472, %v896_v31  ;;  %v617_v41 = vsel %vm593_vm2, %v589_v33, 0.0 }
 0x45d   : > { %v615_v37 = vsel %vm593_vm2, %v588_v32, 0.0  ;;  %v270_v38 = vrot.slane %v269_v44, 2 }
 0x45e   : > { %v616_v5 = vadd.f32 %v615_v37, %v614_v34  ;;  %v590_v39 = vadd.f32 %v572_v35, %v1227_v55 }
 0x45f   : > { %v898_v15 = vpop.eup %897  ;;  %v271_v42 = vadd.f32 %v270_v38, %v269_v44 }
 0x460   : > { %v900_v43 = vpop.eup %899  ;;  %v574_v45 = vmul.f32 0.6931472, %v898_v15  ;;  %v618_v46 = vadd.f32 %v617_v41, %v616_v5  ;;  %v619_v49 = vsel %vm593_vm2, %v590_v39, 0.0 }
 0x461   : > { %v576_v47 = vmul.f32 0.6931472, %v900_v43  ;;  %v272_v48 = vrot.slane %v271_v42, 1 }
 0x462   : > { %v591_v40 = vadd.f32 %v574_v45, %v1231_v61  ;;  %v620_v52 = vadd.f32 %v619_v49, %v618_v46 }
 0x463   : > { %v273_v4 = vadd.f32 %v272_v48, %v271_v42  ;;  %v592_v51 = vadd.f32 %v576_v47, %v1221_v50 }
 0x464   : > { %v621_v9 = vsel %vm593_vm2, %v591_v40, 0.0 }
 0x465   : > { %779 = vpush %v273_v4  ;;  %v622_v55 = vadd.f32 %v621_v9, %v620_v52  ;;  %v623_v53 = vsel %vm593_vm2, %v592_v51, 0.0 }
 0x467   : > { %v624_v54 = vadd.f32 %v623_v53, %v622_v55 }
 0x469   : > { %625 = vadd.xlane.f32.xlu1 %v624_v54 }
 0x496   : > { %s780_s9 = spop %779 }
 0x497   : > { %s634_s10 = smul.f32 14.285714, %s780_s9 }
 0x4f6   : > { %v626_v56 = vpop.xlane.xlu1 %625 }
 0x4f7   : > { %v627_v57 = vrot.slane %v626_v56, 4 }
 0x4f9   : > { %v628_v58 = vadd.f32 %v627_v57, %v626_v56 }
 0x4fb   : > { %v629_v59 = vrot.slane %v628_v58, 2 }
 0x4fd   : > { %v630_v61 = vadd.f32 %v629_v59, %v628_v58 }
 0x4ff   : > { %v631_v62 = vrot.slane %v630_v61, 1 }
 0x501   : > { %v632_v63 = vadd.f32 %v631_v62, %v630_v61 }
 0x503   : > { %781 = vpush %v632_v63 }
 0x534   : > { %s782_s20 = spop %781 }
 0x535   : > { %s635_s22 = ssub.f32 %s782_s20, %s634_s10 }
 0x537   : > { %v636_v50 = vstv %s635_s22 }
 0x538   : > { %637 = vst [vmem:[%s186_s17] sm:$0xff] %v636_v50 }
 0x539   : > { %944 = shalt.err (!%p941_p4)
}
 0x53a   : > { %s945_s29 = scalar_lea.hbm %s1274_s28, 128  ;;  %s949_s23 = scalar_lea.hbm %s1321_s3, 256 }
 0x53b   : > { %p946_p5 = scmp.ne.s32.totalorder %s1274_s28, %s945_s29  ;;  %p950_p0 = scmp.lt.u32.totalorder %s1274_s28, %s1321_s3 }
 0x53c   : > { %p951_p1 = scmp.lt.u32.totalorder %s949_s23, %s945_s29  ;;  %p953_p6 = scmp.lt.u32.totalorder %s945_s29, %s1274_s28 }
 0x53d   : > { %p947_p8 = pnand %p946_p5, %p1330_p11 }
 0x53e   : > { %p952_p3 = por %p951_p1, %p950_p0 }
 0x53f   : > { %p948_p9 = pneg %p947_p8 }
 0x540   : > { %p954_p12 = por %p953_p6, %p952_p3 }
 0x542   : > { %p955_p13 = pnand %p954_p12, %p948_p9 }
 0x544   : > { %958 = shalt.err (!%p955_p13)
}
 0x545   : > { %785 = dma.vmem_to_hbm [thread:$0]  (%p1330_p11), %s1276_s19, 128, %s1274_s28, %s639_s5  }
 0x546 PF: > { %s664_s11 = sand.u32 1, %s985_s12   ;;  %p1331_p7 = scmp.ne.s32.totalorder %s1326_s25, 0 }
 0x547   : > { %p1332_p10 = scmp.ge.s32.totalorder %s997_s15, 2  ;;  %s665_s17 = scalar_lea.sflag [#allocation4], %s664_s11 }
 0x549   : > { %p792_p2 = pnand %p1332_p10, %p1331_p7 }
 0x54b   : > { %980 = dma.done.wait (!%p792_p2), %s665_s17, 128  }
 0x54c   : > { %982 = vsyncadd (!%p792_p2), %s665_s17, 4294967168  ;;  %p16_p4 = scmp.ge.s32.totalorder %s1047_s18, 4   ;;  %s1333_s12 = smov %s989_s13 }
 0x54d   : > { %s1334_s13 = smov %s993_s14  ;;  %s1335_s14 = smov %s1059_s21 }
 0x54e   : > { %s1336_s15 = smov %s1047_s18  ;;  %18 = sbr.rel (!%p16_p4) target bundleno = 5 (0x5), region = 77 }
 0x555   :  { %670 = vsyncpa [#allocation3], 1 }
 0x556   :  { %672 = vsyncpa [#allocation3 + $0x1], 1 }
 0x557   :  { %673 = vsyncpa [#allocation4], 1 }
 0x558   :  { %675 = vsyncpa [#allocation4 + $0x1], 1 }

</bundles_post_ra>
